<compile_context>
chip_gen: v6e
topology: v6e:2x2x1
jax: 0.10.0
libtpu: 0.0.40
codegen_flags: <defaults>
</compile_context>

<pallas_src>
import functools

import jax
import jax.numpy as jnp
from jax.experimental import pallas as pl
from jax.experimental.pallas import tpu as pltpu

P_APPLY = 0.8  # probability of applying fn (RandomApply.p)


def _fn(x):
    # Concrete stand-in for the wrapped callable `fn`: elementwise jitter.
    # TODO(synk): RandomApply wraps an arbitrary callable; only this concrete
    # elementwise fn is implemented in-kernel.
    return x * 1.5 + 0.1


def _apply_fn_kernel(x_ref, o_ref):
    o_ref[...] = _fn(x_ref[...])


_TARGET_BLOCK_BYTES = 4 * 1024 * 1024   # ~4 MiB blocks -> per-step overhead
                                        # (<~0.35 us) is <10% of DMA time on
                                        # v6e/v7x; still fine on v5e.
_VMEM_LIMIT_BYTES = 48 * 1024 * 1024    # explicit scoped-VMEM headroom; safe
                                        # on v5e/v6e (128 MiB) and v7x (64 MiB).


def _choose_tiles(rows, cols, itemsize, target_bytes=_TARGET_BLOCK_BYTES):
    """Pick (row_tile, lane_tile) for the (rows, cols) flattened view.

    Prefer full-width blocks (lane == cols) so each DMA is a single contiguous
    burst; grow the row tile toward `target_bytes` in multiples of the dtype's
    sublane packing.  Ragged edges are handled with cdiv grids + Pallas edge
    masking instead of whole-array fallbacks.
    """
    sub = max(8, 32 // itemsize)          # sublane packing: 8 f32, 16 bf16, 32 i8

    # Lane (last) dim: full width unless even one sublane group is already
    # well past the target, in which case split into 128-multiple tiles.
    if sub * cols * itemsize <= 2 * target_bytes or cols <= 128:
        lane = cols                        # full extent: always legal
    else:
        lane = 128
        while lane * 2 <= cols and sub * (lane * 2) * itemsize <= 2 * target_bytes:
            lane *= 2

    # Row (second-to-last) dim: multiples of `sub`, grown toward target_bytes.
    groups = max(1, target_bytes // max(1, sub * lane * itemsize))
    row = sub * groups
    if row >= rows:
        row = rows                         # full extent: always legal
    return row, lane


def _apply_fn_pallas(x2):
    rows, cols = x2.shape
    rt, lt = _choose_tiles(rows, cols, x2.dtype.itemsize)
    grid = (pl.cdiv(rows, rt), pl.cdiv(cols, lt))
    return pl.pallas_call(
        _apply_fn_kernel,
        out_shape=jax.ShapeDtypeStruct(x2.shape, x2.dtype),
        grid=grid,
        in_specs=[pl.BlockSpec((rt, lt), lambda i, j: (i, j))],
        out_specs=pl.BlockSpec((rt, lt), lambda i, j: (i, j)),
        # In-place: with the input donated, the apply branch writes into the
        # same HBM buffer (no extra output allocation).
        input_output_aliases={0: 0},
        compiler_params=pltpu.CompilerParams(
            # Pure elementwise map -> both axes independent; lets v7x's two
            # TensorCores split the row-block axis.
            # TODO(synk): if a v7x profile shows one idle TC, switch the
            # leading axis to pltpu.CORE_PARALLEL.
            dimension_semantics=("parallel", "parallel"),
            vmem_limit_bytes=_VMEM_LIMIT_BYTES),
        cost_estimate=pl.CostEstimate(
            flops=2 * x2.size,
            transcendentals=0,
            bytes_accessed=2 * x2.size * x2.dtype.itemsize),
    )(x2)


@functools.partial(jax.jit, donate_argnums=(0,), static_argnums=(2,))
def _random_apply_impl(x, key, p):
    N, C, H, W = x.shape
    x2 = x.reshape(N * C, H * W)

    # Coin flip (mirrors `random.random() > self.p`: fn applied iff u <= p).
    u = jax.random.uniform(key, ())
    apply_flag = u <= p

    # Skip branch: x is donated and the pallas_call output aliases its input,
    # so both branches can reuse x's HBM buffer (no full-tensor round trip).
    out2 = jax.lax.cond(apply_flag, _apply_fn_pallas, lambda v: v, x2)
    return out2.reshape(N, C, H, W)


def random_apply(x, key, p=P_APPLY):
    """JAX/Pallas equivalent of RandomApply(fn, p).forward(x).

    NOTE: `x` is donated (in-place friendly); pass a copy if the caller still
    needs the original buffer afterwards.
    """
    return _random_apply_impl(x, key, float(p))


if __name__ == "__main__":
    key = jax.random.PRNGKey(0)
    k_x, k_coin = jax.random.split(key)

    # Small NCHW input consistent with an image-augmentation module.
    x = jax.random.uniform(k_x, (2, 4, 16, 16), dtype=jnp.float32)

    # Exercise several coin draws so both the apply and skip branches run.
    coin_keys = jax.random.split(k_coin, 4)
    for ck in coin_keys:
        # Copy: random_apply donates its input buffer.
        out = jax.block_until_ready(random_apply(x.copy(), ck, p=P_APPLY))
        u = jax.random.uniform(ck, ())
        ref = jnp.where(u <= P_APPLY, _fn(x), x)
        assert out.shape == x.shape and out.dtype == x.dtype
        assert jnp.allclose(out, ref, atol=1e-6), "mismatch vs reference"

    print("KERNEL_OK")
</pallas_src>

<mosaic_0001>
module attributes {stable_mosaic.version = 11 : i64} {
  func.func @_apply_fn_kernel(%arg0: i32, %arg1: i32, %arg2: memref<8x256xf32, #tpu.memory_space<vmem>>, %arg3: memref<8x256xf32, #tpu.memory_space<vmem>>) attributes {dimension_semantics = [#tpu.dimension_semantics<parallel>, #tpu.dimension_semantics<parallel>], iteration_bounds = array<i64: 1, 1>, scalar_prefetch = 0 : i64, scratch_operands = 0 : i64, tpu.core_type = #tpu.core_type<tc>, window_params = [{transform_indices = @transform_0, window_bounds = array<i64: 8, 256>}, {transform_indices = @transform_1, window_bounds = array<i64: 8, 256>}]} {
    %c0 = arith.constant 0 : index
    %c0_0 = arith.constant 0 : index
    %0 = vector.load %arg2[%c0, %c0_0] : memref<8x256xf32, #tpu.memory_space<vmem>>, vector<8x256xf32>
    %cst = arith.constant 1.500000e+00 : f32
    %1 = vector.broadcast %cst : f32 to vector<8x256xf32>
    %2 = arith.mulf %0, %1 : vector<8x256xf32>
    %cst_1 = arith.constant 1.000000e-01 : f32
    %3 = vector.broadcast %cst_1 : f32 to vector<8x256xf32>
    %4 = arith.addf %2, %3 : vector<8x256xf32>
    %c0_2 = arith.constant 0 : index
    %c0_3 = arith.constant 0 : index
    %5 = vector.load %arg3[%c0_2, %c0_3] : memref<8x256xf32, #tpu.memory_space<vmem>>, vector<8x256xf32>
    tpu.vector_store %arg3[%c0_2, %c0_3], %4 {strides = array<i32>} : memref<8x256xf32, #tpu.memory_space<vmem>>, vector<8x256xf32>,
    return
  }
  func.func @transform_0(%arg0: i32, %arg1: i32) -> (i32, i32) {
    %c0_i32 = arith.constant 0 : i32
    return %arg0, %arg1 : i32, i32
  }
  func.func @transform_1(%arg0: i32, %arg1: i32) -> (i32, i32) {
    %c0_i32 = arith.constant 0 : i32
    return %arg0, %arg1 : i32, i32
  }
}

</mosaic_0001>

<bundles_post_ra>
// kernel: branch_1_fun.1
= control target key start
LH: loop header
LB: loop body
LE: loop exit
PB: predicated region body
PF: predicated region fallthrough
CT: control target
= control target key end

     0   :  { %s42_s0 = inlined_call_operand.vmem [shape: f32[8,256], index: 0, kind: input, shape index: {}, may-alias: {0,1}]   ;;  %s43_s1 = inlined_call_operand.vmem [shape: f32[8,256], index: 1, kind: output, shape index: {}, may-alias: {0,1}]  }
   0x1   :  { %v8_v0 = vld [vmem:[%s42_s0] sm:$0xff]  ;;  %v9_v1 = vld [vmem:[%s42_s0 + $0x8] sm:$0xff] }
   0x2   :  { %v10_v2 = vmul.f32 1.5, %v8_v0  ;;  %v11_v3 = vmul.f32 1.5, %v9_v1 }
   0x4   :  { %v12_v4 = vadd.f32 0.1, %v10_v2  ;;  %v13_v5 = vadd.f32 0.1, %v11_v3 }
   0x6   :  { %14 = vst [vmem:[%s43_s1] sm:$0xff] %v12_v4  ;;  %15 = vst [vmem:[%s43_s1 + $0x8] sm:$0xff] %v13_v5 }

</bundles_post_ra>
